<compile_context>
chip_gen: v7x
topology: tpu7x:2x2x1
jax: 0.10.0
libtpu: 0.0.40
codegen_flags: <defaults>
</compile_context>

<pallas_src>
import functools

import numpy as np
import jax
import jax.numpy as jnp
from jax import lax
from jax.experimental import pallas as pl
from jax.experimental.pallas import tpu as pltpu


# LCNN wireframe config: M.head_size = [[2], [1], [2]] -> output channels per head
HEAD_SIZE = [[2], [1], [2]]
HEAD_CHANNELS = sum(HEAD_SIZE, [])          # [2, 1, 2]
NUM_CLASS = sum(HEAD_CHANNELS)              # 5


def _multitask_head_kernel(xf_ref, w1_ref, b1_ref, w2_ref, b2_ref, o_ref, *, wp2):
    # xf_ref: (1, C, P_pad)   bf16  flattened zero-padded image (NCHW, spatial flat)
    # w1_ref: (HID, 9*C)      bf16  stacked 3x3 conv weights, K ordered (ky, kx, c)
    # b1_ref: (HID, 1)        f32
    # w2_ref: (OC, HID)       bf16  block-diagonal 1x1 conv weights
    # b2_ref: (OC, 1)         f32
    # o_ref : (1, OC, P_pad)  f32   lane-dense output (spatial flat on lanes)
    p_pad = xf_ref.shape[2]

    # f32 working copy for the lane rotations / concat (cheap, layout-friendly).
    x = xf_ref[0].astype(jnp.float32)                      # (C, P_pad)

    # Build the fused im2col patch (9*C, P_pad): tap (ky, kx) of the padded
    # image is a pure shift of the flattened spatial axis by ky*(W+2)+kx.
    taps = []
    for ky in range(3):
        for kx in range(3):
            s = ky * wp2 + kx
            taps.append(x if s == 0 else pltpu.roll(x, shift=p_pad - s, axis=1))
    patch = jnp.concatenate(taps, axis=0).astype(jnp.bfloat16)   # (9C, P_pad)

    # Conv3x3 (padding=1) as a single K=9C matmul; channels on sublanes,
    # spatial on lanes -> (HID, P_pad) f32 accumulator (a couple of vregs).
    hidden = jnp.dot(w1_ref[...], patch, preferred_element_type=jnp.float32)
    hidden = jnp.maximum(hidden + b1_ref[...], 0.0)              # bias + ReLU (f32 VPU)

    # Block-diagonal 1x1 conv -> already channel-concatenated heads.
    out = jnp.dot(w2_ref[...], hidden.astype(jnp.bfloat16),
                  preferred_element_type=jnp.float32) + b2_ref[...]
    o_ref[0] = out.astype(o_ref.dtype)


def multitask_head_forward(x_nchw, params):
    """x_nchw: (N, C, H, W) float32.  Returns (N, NUM_CLASS, H, W) float32."""
    w1f, b1, w2f, b2 = params
    N, C, H, W = x_nchw.shape
    HID = w1f.shape[0]
    OC = w2f.shape[0]
    wp2 = W + 2
    P = (H + 2) * wp2
    P_pad = ((P + 127) // 128) * 128          # lane-aligned flat spatial extent

    # Zero-pad H/W by 1 (conv padding=1), flatten spatial, pad to a lane
    # multiple, cast to bf16 for the MXU / halved DMA. Stays in NCHW order.
    xp = jnp.pad(x_nchw, ((0, 0), (0, 0), (1, 1), (1, 1)))
    xf = jnp.pad(xp.reshape(N, C, P), ((0, 0), (0, 0), (0, P_pad - P)))
    xf = xf.astype(jnp.bfloat16)

    kernel = functools.partial(_multitask_head_kernel, wp2=wp2)

    flops = 2 * N * P_pad * (9 * C) * HID + 2 * N * P_pad * HID * OC
    bytes_accessed = (int(xf.size) * 2 + int(w1f.size) * 2 + int(b1.size) * 4
                      + int(w2f.size) * 2 + int(b2.size) * 4
                      + N * OC * P_pad * 4)

    out_flat = pl.pallas_call(
        kernel,
        out_shape=jax.ShapeDtypeStruct((N, OC, P_pad), jnp.float32),
        grid_spec=pltpu.PrefetchScalarGridSpec(
            num_scalar_prefetch=0,
            grid=(N,),
            in_specs=[
                pl.BlockSpec((1, C, P_pad), lambda n: (n, 0, 0)),
                pl.BlockSpec((HID, 9 * C), lambda n: (0, 0)),
                pl.BlockSpec((HID, 1), lambda n: (0, 0)),
                pl.BlockSpec((OC, HID), lambda n: (0, 0)),
                pl.BlockSpec((OC, 1), lambda n: (0, 0)),
            ],
            out_specs=pl.BlockSpec((1, OC, P_pad), lambda n: (n, 0, 0)),
        ),
        compiler_params=pltpu.CompilerParams(
            dimension_semantics=("parallel",),
            vmem_limit_bytes=64 * 1024 * 1024),
        cost_estimate=pl.CostEstimate(flops=flops, transcendentals=0,
                                      bytes_accessed=bytes_accessed),
    )(xf, w1f, b1, w2f, b2)

    # Kernel output is NCHW with padded-grid flat spatial; extract interior.
    # (slice + reshape of a tiny OC=5 tensor; reshape is a free bitcast)
    out = out_flat[:, :, :P].reshape(N, OC, H + 2, wp2)[:, :, :H, :W]
    return out


def make_params(key, input_channels):
    """Deterministic synthetic parameters shaped like the PyTorch module."""
    m = input_channels // 4
    n_heads = len(HEAD_CHANNELS)
    HID = n_heads * m
    OC = NUM_CLASS

    keys = jax.random.split(key, 4 * n_heads)
    w1_list, b1_list, w2_list, b2_list = [], [], [], []
    for h, oc in enumerate(HEAD_CHANNELS):
        k0, k1, k2, k3 = keys[4 * h: 4 * h + 4]
        # conv1 weight in PyTorch OIHW: (m, C, 3, 3); conv2 1x1 weight: (oc, m)
        w1_list.append(0.1 * jax.random.normal(k0, (m, input_channels, 3, 3),
                                               jnp.float32))
        b1_list.append(0.1 * jax.random.normal(k1, (m,), jnp.float32))
        w2_list.append(0.1 * jax.random.normal(k2, (oc, m), jnp.float32))
        b2_list.append(0.1 * jax.random.normal(k3, (oc,), jnp.float32))

    # Stack conv1 weights along HID and flatten K to (ky, kx, c) order to
    # match the kernel's tap ordering.
    w1_stack = jnp.concatenate(w1_list, axis=0)                  # (HID, C, 3, 3)
    w1_flat = jnp.transpose(w1_stack, (0, 2, 3, 1)).reshape(HID, 9 * input_channels)
    b1 = jnp.concatenate(b1_list)[:, None]                       # (HID, 1)

    # Block-diagonal 1x1 weight -> output already concatenated per head.
    w2 = np.zeros((OC, HID), np.float32)
    off = 0
    for h, oc in enumerate(HEAD_CHANNELS):
        w2[off:off + oc, h * m:(h + 1) * m] = np.asarray(w2_list[h])
        off += oc
    b2 = jnp.concatenate(b2_list)[:, None]                       # (OC, 1)

    fused = (w1_flat.astype(jnp.bfloat16), b1,
             jnp.asarray(w2, jnp.bfloat16), b2)
    per_head = (w1_list, b1_list, w2_list, b2_list)
    return fused, per_head, m


def reference_forward(x_nchw, per_head_params):
    """Pure-JAX (lax.conv, f32) reference matching the PyTorch module exactly."""
    w1_list, b1_list, w2_list, b2_list = per_head_params
    outs = []
    for h, _ in enumerate(HEAD_CHANNELS):
        hid = lax.conv_general_dilated(
            x_nchw, w1_list[h], window_strides=(1, 1), padding=((1, 1), (1, 1)),
            dimension_numbers=("NCHW", "OIHW", "NCHW"))
        hid = jnp.maximum(hid + b1_list[h][None, :, None, None], 0.0)
        out = lax.conv_general_dilated(
            hid, w2_list[h][:, :, None, None], window_strides=(1, 1),
            padding=((0, 0), (0, 0)),
            dimension_numbers=("NCHW", "OIHW", "NCHW"))
        outs.append(out + b2_list[h][None, :, None, None])
    return jnp.concatenate(outs, axis=1)


if __name__ == "__main__":
    key = jax.random.PRNGKey(0)
    k_x, k_p = jax.random.split(key)

    N, C, H, W = 2, 8, 16, 16                 # input_channels=8 -> m=2, HID=6, OC=5
    x = jax.random.normal(k_x, (N, C, H, W), jnp.float32)

    params, per_head_params, m = make_params(k_p, C)

    out = jax.block_until_ready(multitask_head_forward(x, params))
    ref = jax.block_until_ready(reference_forward(x, per_head_params))

    assert out.shape == (N, NUM_CLASS, H, W)
    # bf16 MXU inputs with f32 accumulation -> slightly looser tolerance.
    np.testing.assert_allclose(np.asarray(out), np.asarray(ref),
                               rtol=3e-2, atol=3e-2)

    print("KERNEL_OK")
</pallas_src>

<mosaic_0001>
module attributes {stable_mosaic.version = 11 : i64} {
  func.func @_multitask_head_kernel(%arg0: i32, %arg1: memref<1x8x384xbf16, #tpu.memory_space<vmem>>, %arg2: memref<6x72xbf16, #tpu.memory_space<vmem>>, %arg3: memref<6x1xf32, #tpu.memory_space<vmem>>, %arg4: memref<5x6xbf16, #tpu.memory_space<vmem>>, %arg5: memref<5x1xf32, #tpu.memory_space<vmem>>, %arg6: memref<1x5x384xf32, #tpu.memory_space<vmem>>) attributes {dimension_semantics = [#tpu.dimension_semantics<parallel>], iteration_bounds = array<i64: 2>, scalar_prefetch = 0 : i64, scratch_operands = 0 : i64, tpu.core_type = #tpu.core_type<tc>, window_params = [{transform_indices = @transform_0, window_bounds = array<i64: 1, 8, 384>}, {pipeline_mode = #tpu.pipeline_mode<synchronous>, transform_indices = @transform_1, window_bounds = array<i64: 6, 72>}, {pipeline_mode = #tpu.pipeline_mode<synchronous>, transform_indices = @transform_2, window_bounds = array<i64: 6, 1>}, {pipeline_mode = #tpu.pipeline_mode<synchronous>, transform_indices = @transform_3, window_bounds = array<i64: 5, 6>}, {pipeline_mode = #tpu.pipeline_mode<synchronous>, transform_indices = @transform_4, window_bounds = array<i64: 5, 1>}, {transform_indices = @transform_5, window_bounds = array<i64: 1, 5, 384>}]} {
    %c0 = arith.constant 0 : index
    %c0_0 = arith.constant 0 : index
    %c0_1 = arith.constant 0 : index
    %0 = vector.load %arg1[%c0, %c0_0, %c0_1] : memref<1x8x384xbf16, #tpu.memory_space<vmem>>, vector<1x8x384xbf16>
    %1 = vector.shape_cast %0 : vector<1x8x384xbf16> to vector<8x384xbf16>
    %2 = arith.extf %1 : vector<8x384xbf16> to vector<8x384xf32>
    %c383_i32 = arith.constant 383 : i32
    %3 = tpu.dynamic_rotate %2 by %c383_i32 dim 1 : vector<8x384xf32>, i32 -> vector<8x384xf32>
    %c382_i32 = arith.constant 382 : i32
    %4 = tpu.dynamic_rotate %2 by %c382_i32 dim 1 : vector<8x384xf32>, i32 -> vector<8x384xf32>
    %c366_i32 = arith.constant 366 : i32
    %5 = tpu.dynamic_rotate %2 by %c366_i32 dim 1 : vector<8x384xf32>, i32 -> vector<8x384xf32>
    %c365_i32 = arith.constant 365 : i32
    %6 = tpu.dynamic_rotate %2 by %c365_i32 dim 1 : vector<8x384xf32>, i32 -> vector<8x384xf32>
    %c364_i32 = arith.constant 364 : i32
    %7 = tpu.dynamic_rotate %2 by %c364_i32 dim 1 : vector<8x384xf32>, i32 -> vector<8x384xf32>
    %c348_i32 = arith.constant 348 : i32
    %8 = tpu.dynamic_rotate %2 by %c348_i32 dim 1 : vector<8x384xf32>, i32 -> vector<8x384xf32>
    %c347_i32 = arith.constant 347 : i32
    %9 = tpu.dynamic_rotate %2 by %c347_i32 dim 1 : vector<8x384xf32>, i32 -> vector<8x384xf32>
    %c346_i32 = arith.constant 346 : i32
    %10 = tpu.dynamic_rotate %2 by %c346_i32 dim 1 : vector<8x384xf32>, i32 -> vector<8x384xf32>
    %11 = tpu.concatenate %2, %3, %4, %5, %6, %7, %8, %9, %10 in 0 : vector<8x384xf32>, vector<8x384xf32>, vector<8x384xf32>, vector<8x384xf32>, vector<8x384xf32>, vector<8x384xf32>, vector<8x384xf32>, vector<8x384xf32>, vector<8x384xf32> -> vector<72x384xf32>
    %12 = arith.truncf %11 : vector<72x384xf32> to vector<72x384xbf16>
    %c0_2 = arith.constant 0 : index
    %c0_3 = arith.constant 0 : index
    %13 = vector.load %arg2[%c0_2, %c0_3] : memref<6x72xbf16, #tpu.memory_space<vmem>>, vector<6x72xbf16>
    %cst = arith.constant dense<0.000000e+00> : vector<6x384xf32>
    %14 = tpu.matmul %13, %12, %cst {dimension_numbers = #tpu.dot_dimension_numbers<[1], [0], [0], [1], [0, 0, 1, 1], [], []>} : vector<6x72xbf16>, vector<72x384xbf16>, vector<6x384xf32> -> vector<6x384xf32>
    %c0_4 = arith.constant 0 : index
    %c0_5 = arith.constant 0 : index
    %15 = vector.load %arg3[%c0_4, %c0_5] : memref<6x1xf32, #tpu.memory_space<vmem>>, vector<6x1xf32>
    %16 = vector.broadcast %15 : vector<6x1xf32> to vector<6x384xf32>
    %17 = arith.addf %14, %16 : vector<6x384xf32>
    %cst_6 = arith.constant 0.000000e+00 : f32
    %18 = vector.broadcast %cst_6 : f32 to vector<6x384xf32>
    %19 = arith.maximumf %17, %18 : vector<6x384xf32>
    %c0_7 = arith.constant 0 : index
    %c0_8 = arith.constant 0 : index
    %20 = vector.load %arg4[%c0_7, %c0_8] : memref<5x6xbf16, #tpu.memory_space<vmem>>, vector<5x6xbf16>
    %21 = arith.truncf %19 : vector<6x384xf32> to vector<6x384xbf16>
    %cst_9 = arith.constant dense<0.000000e+00> : vector<5x384xf32>
    %22 = tpu.matmul %20, %21, %cst_9 {dimension_numbers = #tpu.dot_dimension_numbers<[1], [0], [0], [1], [0, 0, 1, 1], [], []>} : vector<5x6xbf16>, vector<6x384xbf16>, vector<5x384xf32> -> vector<5x384xf32>
    %c0_10 = arith.constant 0 : index
    %c0_11 = arith.constant 0 : index
    %23 = vector.load %arg5[%c0_10, %c0_11] : memref<5x1xf32, #tpu.memory_space<vmem>>, vector<5x1xf32>
    %24 = vector.broadcast %23 : vector<5x1xf32> to vector<5x384xf32>
    %25 = arith.addf %22, %24 : vector<5x384xf32>
    %c0_12 = arith.constant 0 : index
    %c0_13 = arith.constant 0 : index
    %c0_14 = arith.constant 0 : index
    %26 = vector.load %arg6[%c0_12, %c0_13, %c0_14] : memref<1x5x384xf32, #tpu.memory_space<vmem>>, vector<1x5x384xf32>
    %27 = vector.shape_cast %26 : vector<1x5x384xf32> to vector<5x384xf32>
    %28 = vector.shape_cast %25 : vector<5x384xf32> to vector<1x5x384xf32>
    tpu.vector_store %arg6[%c0_12, %c0_13, %c0_14], %28 {strides = array<i32>} : memref<1x5x384xf32, #tpu.memory_space<vmem>>, vector<1x5x384xf32>,
    return
  }
  func.func @transform_0(%arg0: i32) -> (i32, i32, i32) {
    %c0_i32 = arith.constant 0 : i32
    %c0_i32_0 = arith.constant 0 : i32
    %c0_i32_1 = arith.constant 0 : i32
    return %arg0, %c0_i32, %c0_i32_0 : i32, i32, i32
  }
  func.func @transform_1(%arg0: i32) -> (i32, i32) {
    %c0_i32 = arith.constant 0 : i32
    %c0_i32_0 = arith.constant 0 : i32
    %c0_i32_1 = arith.constant 0 : i32
    return %c0_i32, %c0_i32_0 : i32, i32
  }
  func.func @transform_2(%arg0: i32) -> (i32, i32) {
    %c0_i32 = arith.constant 0 : i32
    %c0_i32_0 = arith.constant 0 : i32
    %c0_i32_1 = arith.constant 0 : i32
    return %c0_i32, %c0_i32_0 : i32, i32
  }
  func.func @transform_3(%arg0: i32) -> (i32, i32) {
    %c0_i32 = arith.constant 0 : i32
    %c0_i32_0 = arith.constant 0 : i32
    %c0_i32_1 = arith.constant 0 : i32
    return %c0_i32, %c0_i32_0 : i32, i32
  }
  func.func @transform_4(%arg0: i32) -> (i32, i32) {
    %c0_i32 = arith.constant 0 : i32
    %c0_i32_0 = arith.constant 0 : i32
    %c0_i32_1 = arith.constant 0 : i32
    return %c0_i32, %c0_i32_0 : i32, i32
  }
  func.func @transform_5(%arg0: i32) -> (i32, i32, i32) {
    %c0_i32 = arith.constant 0 : i32
    %c0_i32_0 = arith.constant 0 : i32
    %c0_i32_1 = arith.constant 0 : i32
    return %arg0, %c0_i32, %c0_i32_0 : i32, i32, i32
  }
}

</mosaic_0001>

<bundles_post_ra>
// kernel: tpu_custom_call.1
= control target key start
LH: loop header
LB: loop body
LE: loop exit
PB: predicated region body
PF: predicated region fallthrough
CT: control target
= control target key end

     0   :  { %10 = vsyncpa [#allocation3], 0  ;;  %s1504_s0 = inlined_call_operand.hbm [shape: bf16[2,8,384], index: 0, kind: input, shape index: {}]   ;;  %s1505_s1 = inlined_call_operand.hbm [shape: bf16[6,72], index: 1, kind: input, shape index: {}]   ;;  %s1506_s2 = inlined_call_operand.hbm [shape: f32[6,1], index: 2, kind: input, shape index: {}]   ;;  %s1507_s3 = inlined_call_operand.hbm [shape: bf16[5,6], index: 3, kind: input, shape index: {}]   ;;  %s1508_s4 = inlined_call_operand.hbm [shape: f32[5,1], index: 4, kind: input, shape index: {}]   ;;  %s1509_s5 = inlined_call_operand.hbm [shape: f32[2,5,384], index: 5, kind: output, shape index: {}]  }
   0x1   :  { %12 = vsyncpa [#allocation3 + $0x1], 0 }
   0x2   :  { %13 = vsyncpa [#allocation6], 0 }
   0x3   :  { %14 = vsyncpa [#allocation9], 0 }
   0x4   :  { %15 = vsyncpa [#allocation4], 0 }
   0x5   :  { %17 = vsyncpa [#allocation4 + $0x1], 0  ;;  %s1190_s18 = smov 0   ;;  %s1192_s19 = smov 0  }
   0x6   :  { %s1194_s20 = smov 0   ;;  %s1196_s21 = smov 0  }
   0x7 LB: > { %s1143_s22 = smov [#allocation5]   ;;  %s1211_s24 = sadd.s32 4294967295, %s1141_s21   ;;  %s1141_s21 = sphi %s1196_s21, %s1532_s21   ;;  %s1137_s20 = sphi %s1194_s20, %s1531_s20   ;;  %s1133_s19 = sphi %s1192_s19, %s1530_s19   ;;  %s1129_s18 = sphi %s1190_s18, %s1529_s18  }
   0x8   : > { %s177_s23 = sshll.u32 %s1143_s22, 4  ;;  %p731_p0 = scmp.ge.s32.totalorder %s1141_s21, 1  ;;  %s1216_s23 = int_to_ptr.vmem [resolvable:$true] %s177_s23 }
   0x9   : > { %p1510_p1 = scmp.eq.s32.totalorder %s1211_s24, 0  ;;  %p164_p2 = scmp.lt.s32.totalorder %s1141_s21, 3 }
   0xa   : > { %s1144_s26 = smov [#allocation8]   ;;  %s1145_s28 = smov [#allocation7]  }
   0xb   : > { %p1218_p3 = pnand %p731_p0, %p164_p2  ;;  %s199_s27 = sshll.u32 %s1144_s26, 4  ;;  %s1225_s27 = int_to_ptr.vmem [resolvable:$true] %s199_s27 }
   0xc   : > { %s188_s29 = sshll.u32 %s1145_s28, 4  ;;  %s1146_s6 = smov [#allocation10]   ;;  %s1233_s29 = int_to_ptr.vmem [resolvable:$true] %s188_s29 }
   0xd   : > { %s1513_s25 = scalar_select %p1218_p3, 1, 0 }
   0xe   : > { %p805_p5 = pneg %p1218_p3  ;;  %s1235_s7 = sshll.u32 %s1146_s6, 4  ;;  %s211_s7 = int_to_ptr.vmem [resolvable:$true] %s1235_s7 }
   0xf   : > { %s925_s10 = scalar_lea.hbm %s1505_s1, 64 }
  0x10   : > { %p1229_p6 = pnand %p805_p5, %p1510_p1  ;;  %p926_p7 = scmp.ne.s32.totalorder %s1505_s1, %s925_s10 }
  0x11   : > { %p932_p11 = scmp.lt.u32.totalorder %s925_s10, %s1505_s1 }
  0x12   : > { %p1245_p8 = pneg %p1229_p6 }
  0x14   : > { %p928_p9 = pnand %p1245_p8, %p926_p7 }
  0x16   : > { %p929_p10 = pneg %p928_p9 }
  0x18   : > { %p934_p12 = pnand %p932_p11, %p929_p10 }
  0x1a   : > { %937 = shalt.err (!%p934_p12)
}
  0x1b   : > { %s938_s16 = scalar_lea.vmem %s1216_s23, 64  ;;  %p946_p5 = scmp.lt.s32.totalorder %s1216_s23, %s1216_s23 }
  0x1c   : > { %p939_p13 = scmp.ne.s32.totalorder %s1216_s23, %s938_s16  ;;  %p947_p4 = scmp.lt.s32.totalorder %s938_s16, %s938_s16 }
  0x1e   : > { %p941_p0 = pnand %p939_p13, %p1245_p8  ;;  %p948_p7 = por %p947_p4, %p946_p5 }
  0x20   : > { %p942_p2 = pneg %p941_p0 }
  0x22   : > { %p949_p9 = pnand %p948_p7, %p942_p2 }
  0x24   : > { %952 = shalt.err (!%p949_p9)
}
  0x25   : > { %808 = dma.hbm_to_vmem [thread:$0]  (!%p1229_p6), %s1505_s1, 64, %s1216_s23, [#allocation6]  }
  0x26   : > { %s953_s6 = scalar_lea.hbm %s1507_s3, 64 }
  0x27   : > { %p954_p10 = scmp.ne.s32.totalorder %s1507_s3, %s953_s6  ;;  %p960_p12 = scmp.lt.u32.totalorder %s953_s6, %s1507_s3 }
  0x29   : > { %p956_p4 = pnand %p954_p10, %p1245_p8 }
  0x2b   : > { %p957_p11 = pneg %p956_p4 }
  0x2d   : > { %p962_p13 = pnand %p960_p12, %p957_p11 }
  0x2f   : > { %965 = shalt.err (!%p962_p13)
}
  0x30   : > { %s966_s23 = scalar_lea.vmem %s1225_s27, 64  ;;  %p974_p7 = scmp.lt.s32.totalorder %s1225_s27, %s1225_s27 }
  0x31   : > { %p967_p0 = scmp.ne.s32.totalorder %s1225_s27, %s966_s23  ;;  %p975_p9 = scmp.lt.s32.totalorder %s966_s23, %s966_s23 }
  0x33   : > { %p969_p2 = pnand %p967_p0, %p1245_p8  ;;  %p976_p10 = por %p975_p9, %p974_p7 }
  0x35   : > { %p970_p5 = pneg %p969_p2 }
  0x37   : > { %p977_p4 = pnand %p976_p10, %p970_p5 }
  0x39   : > { %980 = shalt.err (!%p977_p4)
}
  0x3a   : > { %814 = dma.hbm_to_vmem [thread:$0]  (!%p1229_p6), %s1507_s3, 64, %s1225_s27, [#allocation9]  }
  0x3b   : > { %s981_s17 = scalar_lea.hbm %s1506_s2, 128 }
  0x3c   : > { %p982_p11 = scmp.ne.s32.totalorder %s1506_s2, %s981_s17  ;;  %p988_p0 = scmp.lt.u32.totalorder %s981_s17, %s1506_s2 }
  0x3e   : > { %p984_p12 = pnand %p982_p11, %p1245_p8 }
  0x40   : > { %p985_p13 = pneg %p984_p12 }
  0x42   : > { %p990_p2 = pnand %p988_p0, %p985_p13 }
  0x44   : > { %993 = shalt.err (!%p990_p2)
}
  0x45   : > { %s994_s27 = scalar_lea.vmem %s1233_s29, 128  ;;  %p1002_p10 = scmp.lt.s32.totalorder %s1233_s29, %s1233_s29 }
  0x46   : > { %p995_p5 = scmp.ne.s32.totalorder %s1233_s29, %s994_s27  ;;  %p1003_p4 = scmp.lt.s32.totalorder %s994_s27, %s994_s27 }
  0x48   : > { %p997_p7 = pnand %p995_p5, %p1245_p8  ;;  %p1004_p11 = por %p1003_p4, %p1002_p10 }
  0x4a   : > { %p998_p9 = pneg %p997_p7 }
  0x4c   : > { %p1005_p12 = pnand %p1004_p11, %p998_p9 }
  0x4e   : > { %1008 = shalt.err (!%p1005_p12)
}
  0x4f   : > { %811 = dma.hbm_to_vmem [thread:$0]  (!%p1229_p6), %s1506_s2, 128, %s1233_s29, [#allocation6]  }
  0x50   : > { %s1009_s23 = scalar_lea.hbm %s1508_s4, 128 }
  0x51   : > { %p1010_p13 = scmp.ne.s32.totalorder %s1508_s4, %s1009_s23  ;;  %p1016_p5 = scmp.lt.u32.totalorder %s1009_s23, %s1508_s4 }
  0x53   : > { %p1012_p0 = pnand %p1010_p13, %p1245_p8 }
  0x55   : > { %p1013_p2 = pneg %p1012_p0 }
  0x57   : > { %p1018_p7 = pnand %p1016_p5, %p1013_p2 }
  0x59   : > { %1021 = shalt.err (!%p1018_p7)
}
  0x5a   : > { %s1022_s17 = scalar_lea.vmem %s211_s7, 128  ;;  %p1030_p11 = scmp.lt.s32.totalorder %s211_s7, %s211_s7 }
  0x5b   : > { %p1023_p9 = scmp.ne.s32.totalorder %s211_s7, %s1022_s17  ;;  %p1031_p12 = scmp.lt.s32.totalorder %s1022_s17, %s1022_s17 }
  0x5d   : > { %p1025_p10 = pnand %p1023_p9, %p1245_p8  ;;  %p1032_p1 = por %p1031_p12, %p1030_p11 }
  0x5f   : > { %p1026_p4 = pneg %p1025_p10 }
  0x61   : > { %p1033_p3 = pnand %p1032_p1, %p1026_p4 }
  0x63   : > { %1036 = shalt.err (!%p1033_p3)
}
  0x64   : > { %817 = dma.hbm_to_vmem [thread:$0]  (!%p1229_p6), %s1508_s4, 128, %s211_s7, [#allocation9]  }
  0x65   : > { %s730_s13 = sadd.s32 4294967294, %s1141_s21   ;;  %s1333_s30 = sadd.s32 1, %s1141_s21  }
  0x66   : > { %s27_s26 = ssub.s32 %s1141_s21, %s1333_s30  ;;  %s30_s28 = sadd.s32 1, %s1137_s20 }
  0x67   : > { %p28_p1 = scmp.eq.s32.totalorder %s27_s26, 0  ;;  %p37_p3 = scmp.ne.s32.totalorder %s1137_s20, %s1133_s19 }
  0x68   : > { %p38_p8 = scmp.eq.s32.totalorder %s1141_s21, 0  ;;  %p43_p13 = scmp.ne.s32.totalorder %s1133_s19, %s1129_s18 }
  0x69   : > { %s1344_s6 = scalar_select %p28_p1, %s1137_s20, %s30_s28  }
  0x6a   : > { %p39_p0 = por %p38_p8, %p37_p3  ;;  %p1516_p2 = scmp.eq.s32.totalorder %s1211_s24, 0 }
  0x6b   : > { %p151_p6 = scmp.eq.s32.totalorder %s1211_s24, 1  ;;  %p157_p7 = scmp.eq.s32.totalorder %s730_s13, 1 }
  0x6c   : > { %p1348_p5 = por %p1516_p2, %p43_p13  ;;  %p830_p9 = scmp.lt.s32.totalorder %s1141_s21, 2 }
  0x6d   : > { %s221_s7 = sand.u32 1, %s1137_s20   ;;  %p1355_p10 = por %p151_p6, %p37_p3 }
  0x6e   : > { %p1359_p4 = por %p157_p7, %p43_p13  ;;  %s780_s10 = smul.u32 12, %s221_s7 }
  0x6f   : > { %s1518_s8 = scalar_select %p1355_p10, 1, 0 }
  0x70   : > { %s1519_s9 = scalar_select %p1359_p4, 1, 0 }
  0x71   : > { %s781_s11 = smul.u32 192, %s1141_s21  ;;  %p1364_p11 = pnand %p830_p9, %p39_p0 }
  0x72   : > { %s225_s16 = scalar_lea.vmem [#allocation2], %s780_s10  ;;  %s222_s29 = scalar_lea.sflag [#allocation3], %s221_s7 }
  0x73   : > { %s1371_s15 = scalar_lea.hbm %s1504_s0, %s781_s11  ;;  %s233_s17 = sshll.u32 %s225_s16, 4  ;;  %s1373_s17 = int_to_ptr.vmem [resolvable:$true] %s233_s17 }
  0x74   : > { %s1037_s22 = scalar_lea.hbm %s1371_s15, 192  ;;  %p1039_p1 = pneg %p1364_p11 }
  0x75   : > { %p1038_p12 = scmp.ne.s32.totalorder %s1371_s15, %s1037_s22  ;;  %s1042_s28 = scalar_lea.hbm %s1504_s0, 384 }
  0x76   : > { %p1043_p13 = scmp.lt.u32.totalorder %s1371_s15, %s1504_s0  ;;  %p1044_p0 = scmp.lt.u32.totalorder %s1042_s28, %s1037_s22 }
  0x77   : > { %p1040_p3 = pnand %p1039_p1, %p1038_p12  ;;  %p1046_p6 = scmp.lt.u32.totalorder %s1037_s22, %s1371_s15 }
  0x78   : > { %p1045_p2 = por %p1044_p0, %p1043_p13 }
  0x79   : > { %p1041_p8 = pneg %p1040_p3 }
  0x7a   : > { %p1047_p7 = por %p1046_p6, %p1045_p2 }
  0x7c   : > { %p1048_p9 = pnand %p1047_p7, %p1041_p8 }
  0x7e   : > { %1051 = shalt.err (!%p1048_p9)
}
  0x7f   : > { %s1052_s7 = scalar_lea.vmem %s1373_s17, 192  ;;  %s1147_s10 = smov [#allocation2]  }
  0x80   : > { %p1053_p12 = scmp.ne.s32.totalorder %s1373_s17, %s1052_s7  ;;  %s1057_s14 = sshll.u32 %s1147_s10, 4  ;;  %s1058_s14 = int_to_ptr.vmem [resolvable:$false] %s1057_s14 }
  0x81   : > { %s1059_s16 = scalar_lea.vmem %s1058_s14, 384  ;;  %p1060_p10 = scmp.lt.s32.totalorder %s1373_s17, %s1058_s14 }
  0x82   : > { %p1055_p3 = pnand %p1053_p12, %p1039_p1  ;;  %p1061_p13 = scmp.lt.s32.totalorder %s1059_s16, %s1052_s7 }
  0x84   : > { %p1056_p4 = pneg %p1055_p3  ;;  %p1062_p0 = por %p1061_p13, %p1060_p10 }
  0x86   : > { %p1063_p2 = pnand %p1062_p0, %p1056_p4 }
  0x88   : > { %1066 = shalt.err (!%p1063_p2)
}
  0x89   : > { %821 = dma.hbm_to_vmem [thread:$0]  (!%p1364_p11), %s1371_s15, 192, %s1373_s17, %s222_s29  }
  0x8a   : > { %p1521_p8 = scmp.ne.s32.totalorder %s1513_s25, 0 }
  0x8b   : > { %s1403_s22 = sand.u32 (!%p1521_p8), 1, %s1133_s19  }
  0x8c   : > { %242 = sbr.rel (%p1521_p8) target bundleno = 764 (0x2fc), region = 40  ;;  %s245_s26 = scalar_lea.sflag (!%p1521_p8), [#allocation3], %s1403_s22 }
  0x8d   : > { %s782_s13 = smul.u32 (!%p1521_p8), 12, %s1403_s22 }
  0x8f   : > { %s248_s28 = scalar_lea.vmem (!%p1521_p8), [#allocation2], %s782_s13 }
  0x93   : > { %1112 = dma.done.wait (%p1348_p5), %s245_s26, 192  }
  0x94   : > { %1114 = vsyncadd (%p1348_p5), %s245_s26, 4294967104  ;;  %p1522_p10 = scmp.eq.s32.totalorder %s1211_s24, 0 }
  0x96   : > { %1116 = dma.done.wait (%p1522_p10), [#allocation6], 192   ;;  %p1523_p4 = pmov %p1522_p10 }
  0x98   : > { %1118 = vsyncadd (%p1523_p4), [#allocation6], 4294967104  ;;  %p1524_p11 = pmov %p1523_p4 }
  0x99   : > { %p1525_p1 = pmov %p1523_p4 }
  0x9a   : > { %1120 = dma.done.wait (%p1524_p11), [#allocation9], 192  }
  0x9b   : > { %1122 = vsyncadd (%p1525_p1), [#allocation9], 4294967104  ;;  %v1148_v0 = vmov 0.0   ;;  %v292_v1 = vld [vmem:[%s248_s28] sm:$0xff]  ;;  %v293_v2 = vld [vmem:[%s248_s28 + $0x8] sm:$0xf]  ;;  %v303_v10 = vlaneseq }
  0x9c   : > { %760 = vmatprep.subr.bf16.mxu1 %v1148_v0  ;;  %v295_v3 = vunpack.c.h.bf16 %v292_v1  ;;  %v296_v4 = vunpack.c.l.bf16 %v293_v2  ;;  %s1149_s25 = smov 126   ;;  %s1150_s27 = smov 127   ;;  %v294_v6 = vunpack.c.l.bf16 %v292_v1  ;;  %v1156_v7 = vmov 0   ;;  %v395_v9 = vld [vmem:[#allocation7] sm:$0x3f] }
  0x9d   : > { %s1151_s23 = smov 110   ;;  %s1152_s15 = smov 108   ;;  %447 = vmatprep.mubr.bf16.mxu0 %v1156_v7  ;;  %vm1157_vm0 = vmmov 0   ;;  %923 = vset.pattern.permute.xlu0 %v1156_v7  ;;  %v1425_v11 = vand.u32 127, %v303_v10  ;;  %vm405_vm9 = vcmask 1043456   ;;  %vm401_vm10 = vcmask 588800  }
  0x9e   : > { %v888_v5 = vpack.i.bf16 %v296_v4, %v295_v3  ;;  %s1153_s17 = smov 109   ;;  %s1154_s29 = smov 91   ;;  %770 = vmatprep.mubr.msk.bf16.mxu1 %vm1157_vm0, %v1148_v0  ;;  %924 = vset.pattern.permute.xlu1 %v1156_v7  ;;  %v918_v8 = vpack.i.bf16 %v295_v3, %v294_v6  ;;  %vm513_vm11 = vcmask 1042432   ;;  %vm509_vm12 = vcmask 48128  }
  0x9f   : > { %s1155_s11 = smov 92   ;;  %s1158_s12 = smov 90   ;;  %vm305_vm1 = vcmp.lt.s32.totalorder %v1425_v11, 127  ;;  %vm325_vm2 = vcmp.lt.s32.totalorder %v1425_v11, 110  ;;  %vm315_vm3 = vcmp.lt.s32.totalorder %v1425_v11, 126  ;;  %vm345_vm4 = vcmp.lt.s32.totalorder %v1425_v11, 108 }
  0xa0   : > { %889 = vrot.lane.b32.xlu1 %v888_v5, %s1149_s25  ;;  %884 = vrot.lane.b32.xlu0 %v888_v5, %s1150_s27  ;;  %vm335_vm5 = vcmp.lt.s32.totalorder %v1425_v11, 109  ;;  %vm365_vm6 = vcmp.lt.s32.totalorder %v1425_v11, 91  ;;  %vm355_vm7 = vcmp.lt.s32.totalorder %v1425_v11, 92  ;;  %vm375_vm8 = vcmp.lt.s32.totalorder %v1425_v11, 90  ;;  %v503_v11 = vld [vmem:[#allocation10] sm:$0x1f] }
  0xa1   : > { %s783_s7 = smul.u32 24, %s1403_s22  ;;  %p1526_p6 = scmp.ne.s32.totalorder %s1518_s8, 0 }
  0xa2   : > { %s784_s10 = smul.u32 384, %s1211_s24  ;;  %s608_s24 = scalar_lea.sflag [#allocation4], %s1403_s22 }
  0xa3   : > { %s290_s14 = scalar_lea.vmem [#allocation11], %s783_s7 }
  0xa4   : > { %894 = vrot.lane.b32.xlu1 %v888_v5, %s1151_s23  ;;  %297 = vrot.lane.b32.xlu0 %v294_v6, %s1150_s27  ;;  %s622_s16 = sshll.u32 %s290_s14, 4  ;;  %s1460_s28 = scalar_lea.hbm %s1509_s5, %s784_s10  ;;  %s1462_s16 = int_to_ptr.vmem [resolvable:$true] %s622_s16 }
  0xa5   : > { %s1159_s27 = smov [#allocation11]  }
  0xa8   : > { %319 = vrot.lane.b32.xlu1 %v294_v6, %s1151_s23  ;;  %309 = vrot.lane.b32.xlu0 %v294_v6, %s1149_s25  ;;  %s1067_s25 = scalar_lea.vmem %s1462_s16, 384  ;;  %s1071_s23 = sshll.u32 %s1159_s27, 4  ;;  %s1072_s23 = int_to_ptr.vmem [resolvable:$false] %s1071_s23 }
  0xa9   : > { %p1068_p5 = scmp.ne.s32.totalorder %s1462_s16, %s1067_s25  ;;  %p1074_p12 = scmp.lt.s32.totalorder %s1462_s16, %s1072_s23 }
  0xab   : > { %p1069_p7 = pnand %p1068_p5, %p1526_p6 }
  0xac   : > { %904 = vrot.lane.b32.xlu1 %v888_v5, %s1152_s15  ;;  %899 = vrot.lane.b32.xlu0 %v888_v5, %s1153_s17 }
  0xad   : > { %p1070_p9 = pneg %p1069_p7 }
  0xb0   : > { %339 = vrot.lane.b32.xlu1 %v294_v6, %s1152_s15  ;;  %329 = vrot.lane.b32.xlu0 %v294_v6, %s1153_s17  ;;  %s1073_s15 = scalar_lea.vmem %s1072_s23, 768 }
  0xb1   : > { %p1075_p3 = scmp.lt.s32.totalorder %s1073_s15, %s1067_s25 }
  0xb3   : > { %p1076_p13 = por %p1075_p3, %p1074_p12 }
  0xb4   : > { %914 = vrot.lane.b32.xlu1 %v888_v5, %s1154_s29  ;;  %909 = vrot.lane.b32.xlu0 %v888_v5, %s1155_s11 }
  0xb5   : > { %p1077_p0 = pnand %p1076_p13, %p1070_p9 }
  0xb8   : > { %359 = vrot.lane.b32.xlu1 %v294_v6, %s1154_s29  ;;  %349 = vrot.lane.b32.xlu0 %v294_v6, %s1155_s11 }
  0xbc   : > { %919 = vrot.lane.b32.xlu0 %v918_v8, %s1158_s12  ;;  %373 = vrot.lane.b32.xlu1 %v296_v4, %s1158_s12 }
  0xc0   : > { %398 = vperm.xlu0 %923, %v395_v9   ;;  %506 = vperm.xlu1 %924, %v503_v11  }
 0x112   : > { %v890_v12 = vpop.permute.xlu1 %889  ;;  %v885_v13 = vpop.permute.xlu0 %884 }
 0x113   : > { %v887_v14 = vunpack.i.h.bf16 %v885_v13  ;;  %v886_v15 = vunpack.i.l.bf16 %v885_v13  ;;  %v892_v16 = vunpack.i.h.bf16 %v890_v12  ;;  %v891_v17 = vunpack.i.l.bf16 %v890_v12 }
 0x115   : > { %v306_v18 = vsel %vm305_vm1, %v886_v15, %v887_v14  ;;  %v316_v28 = vsel %vm315_vm3, %v891_v17, %v892_v16 }
 0x116   : > { %v895_v19 = vpop.permute.xlu1 %894  ;;  %v298_v20 = vpop.permute.xlu0 %297  ;;  %v380_v21 = vpack.c.bf16 %v306_v18, %v295_v3 }
 0x117   : > { %v897_v22 = vunpack.i.h.bf16 %v895_v19  ;;  %v896_v23 = vunpack.i.l.bf16 %v895_v19  ;;  %v307_v24 = vsel %vm305_vm1, %v298_v20, %v886_v15  ;;  %v308_v25 = vsel %vm305_vm1, %v887_v14, %v298_v20 }
 0x118   : > { %415 = vmatprep.subr.bf16.mxu0 %v380_v21  ;;  %v379_v26 = vpack.c.bf16 %v307_v24, %v294_v6  ;;  %v381_v27 = vpack.c.bf16 %v308_v25, %v296_v4  ;;  %v394_v24 = vld [vmem:[#allocation5] sm:$0x7] }
 0x119   : > { %v326_v29 = vsel %vm325_vm2, %v896_v23, %v897_v22 }
 0x11a   : > { %v320_v30 = vpop.permute.xlu1 %319  ;;  %416 = vmatpush1.bf16.msra.mxu0 %v379_v26  ;;  %761 = vmatpush3.bf16.msra.mxu1 %v381_v27  ;;  %v310_v31 = vpop.permute.xlu0 %309  ;;  %v383_v32 = vpack.c.bf16 %v326_v29, %v316_v28 }
 0x11b   : > { %v327_v33 = vsel %vm325_vm2, %v320_v30, %v896_v23  ;;  %v328_v34 = vsel %vm325_vm2, %v897_v22, %v320_v30  ;;  %v317_v35 = vsel %vm315_vm3, %v310_v31, %v891_v17  ;;  %v318_v36 = vsel %vm315_vm3, %v892_v16, %v310_v31  ;;  %762 = vmatprep.subr.bf16.mxu1 %v1148_v0 }
 0x11c   : > { %v382_v37 = vpack.c.bf16 %v327_v33, %v317_v35  ;;  %v384_v38 = vpack.c.bf16 %v328_v34, %v318_v36  ;;  %417 = vmatprep.subr.bf16.mxu0 %v383_v32 }
 0x11e   : > { %v905_v39 = vpop.permute.xlu1 %904  ;;  %418 = vmatpush1.bf16.msra.mxu0 %v382_v37  ;;  %763 = vmatpush3.bf16.msra.mxu1 %v384_v38  ;;  %v900_v40 = vpop.permute.xlu0 %899 }
 0x11f   : > { %v907_v41 = vunpack.i.h.bf16 %v905_v39  ;;  %v906_v42 = vunpack.i.l.bf16 %v905_v39  ;;  %v902_v43 = vunpack.i.h.bf16 %v900_v40  ;;  %v901_v44 = vunpack.i.l.bf16 %v900_v40  ;;  %764 = vmatprep.subr.bf16.mxu1 %v1148_v0 }
 0x121   : > { %v336_v45 = vsel %vm335_vm5, %v901_v44, %v902_v43  ;;  %v346_v46 = vsel %vm345_vm4, %v906_v42, %v907_v41 }
 0x122   : > { %v340_v47 = vpop.permute.xlu1 %339  ;;  %v330_v48 = vpop.permute.xlu0 %329  ;;  %v386_v49 = vpack.c.bf16 %v346_v46, %v336_v45 }
 0x123   : > { %v347_v50 = vsel %vm345_vm4, %v340_v47, %v906_v42  ;;  %v348_v51 = vsel %vm345_vm4, %v907_v41, %v340_v47  ;;  %v337_v52 = vsel %vm335_vm5, %v330_v48, %v901_v44  ;;  %v338_v53 = vsel %vm335_vm5, %v902_v43, %v330_v48  ;;  %v499_v43 = vld [vmem:[#allocation8] sm:$0x7] }
 0x124   : > { %v385_v54 = vpack.c.bf16 %v347_v50, %v337_v52  ;;  %v387_v55 = vpack.c.bf16 %v348_v51, %v338_v53  ;;  %419 = vmatprep.subr.bf16.mxu0 %v386_v49 }
 0x126   : > { %v915_v56 = vpop.permute.xlu1 %914  ;;  %v910_v57 = vpop.permute.xlu0 %909  ;;  %420 = vmatpush1.bf16.msra.mxu0 %v385_v54  ;;  %765 = vmatpush3.bf16.msra.mxu1 %v387_v55 }
 0x127   : > { %v917_v58 = vunpack.i.h.bf16 %v915_v56  ;;  %v916_v59 = vunpack.i.l.bf16 %v915_v56  ;;  %v912_v60 = vunpack.i.h.bf16 %v910_v57  ;;  %v911_v61 = vunpack.i.l.bf16 %v910_v57  ;;  %766 = vmatprep.subr.bf16.mxu1 %v1148_v0 }
 0x129   : > { %v356_v62 = vsel %vm355_vm7, %v911_v61, %v912_v60  ;;  %v366_v63 = vsel %vm365_vm6, %v916_v59, %v917_v58 }
 0x12a   : > { %v360_v1 = vpop.permute.xlu1 %359  ;;  %v350_v2 = vpop.permute.xlu0 %349  ;;  %v389_v3 = vpack.c.bf16 %v366_v63, %v356_v62 }
 0x12b   : > { %v367_v4 = vsel %vm365_vm6, %v360_v1, %v916_v59  ;;  %v368_v5 = vsel %vm365_vm6, %v917_v58, %v360_v1  ;;  %v357_v6 = vsel %vm355_vm7, %v350_v2, %v911_v61  ;;  %v358_v8 = vsel %vm355_vm7, %v912_v60, %v350_v2 }
 0x12c   : > { %v388_v9 = vpack.c.bf16 %v367_v4, %v357_v6  ;;  %v390_v10 = vpack.c.bf16 %v368_v5, %v358_v8  ;;  %421 = vmatprep.subr.bf16.mxu0 %v389_v3 }
 0x12e   : > { %v920_v12 = vpop.permute.xlu0 %919  ;;  %422 = vmatpush1.bf16.msra.mxu0 %v388_v9  ;;  %767 = vmatpush3.bf16.msra.mxu1 %v390_v10  ;;  %v374_v13 = vpop.permute.xlu1 %373 }
 0x12f   : > { %v922_v14 = vunpack.i.h.bf16 %v920_v12  ;;  %v921_v15 = vunpack.i.l.bf16 %v920_v12  ;;  %768 = vmatprep.subr.bf16.mxu1 %v1148_v0 }
 0x131   : > { %v376_v16 = vsel %vm375_vm8, %v922_v14, %v374_v13  ;;  %v378_v17 = vsel %vm375_vm8, %v374_v13, %v921_v15  ;;  %v377_v18 = vsel %vm375_vm8, %v921_v15, %v922_v14 }
 0x132   : > { %v392_v19 = vpack.c.bf16 %v376_v16, %v376_v16  ;;  %v393_v20 = vpack.c.bf16 %v378_v17, %v378_v17  ;;  %v391_v21 = vpack.c.bf16 %v377_v18, %v377_v18 }
 0x134   : > { %743 = vmatprep.subr.msk.bf16.mxu0 %vm405_vm9, %v392_v19  ;;  %v407_v22 = vsel %vm405_vm9, %v391_v21, 0  ;;  %v413_v23 = vsel %vm405_vm9, %v393_v20, 0 }
 0x135   : > { %424 = vmatpush1.bf16.msra.mxu0 %v407_v22  ;;  %769 = vmatpush3.bf16.msra.mxu1 %v413_v23 }
 0x136   : > { %774 = vmatprep.subr.bf16.mxu1 %v1148_v0 }
 0x138   : > { %744 = vmatmul.mubr.msk.bf16.vlgmr.msra.gmra.mrb[0].mxu0 %vm401_vm10, %v394_v24  ;;  %771 = vmatmul.mubr.msk.bf16.vlgmr.msra.gmra.mrb[0].mxu1 %vm401_vm10, %v394_v24 }
 0x139   : > { %555 = vmatprep.mubr.bf16.mxu0 %v1156_v7  ;;  %776 = vmatprep.mubr.msk.bf16.mxu1 %vm1157_vm0, %v1148_v0 }
 0x13f   : > { %v399_v25 = vpop.permute.xlu0 %398  ;;  %v507_v44 = vpop.permute.xlu1 %506 }
 0x20b   : > { %v449_v26 = vpop.f32.mrb[0].mxu0  ;;  %v490_v27 = vpop.f32.mrb[0].mxu1 }
 0x20c   : > { %v450_v28 = vadd.f32 %v449_v26, %v399_v25  ;;  %v491_v29 = vadd.f32 %v490_v27, %v399_v25  ;;  %v451_v30 = vpop.f32.mrb[1].mxu0  ;;  %v772_v31 = vpop.f32.mrb[1].mxu1 }
 0x20d   : > { %v452_v32 = vadd.f32 %v451_v30, %v399_v25  ;;  %v453_v33 = vpop.f32.mrb[2].mxu0  ;;  %v493_v34 = vpop.f32.mrb[2].mxu1 }
 0x20e   : > { %v496_v35 = vmax.f32 %v450_v28, 0.0  ;;  %v498_v36 = vmax.f32 %v491_v29, 0.0  ;;  %v454_v37 = vpop.f32.mrb[3].mxu0  ;;  %v773_v7 = vpop.f32.mrb[3].mxu1 }
 0x20f   : > { %v497_v38 = vmax.f32 %v452_v32, 0.0 }
 0x210   : > { %v500_v0 = vpack.c.bf16 %v496_v35, %v496_v35  ;;  %v502_v39 = vpack.c.bf16 %v498_v36, %v498_v36 }
 0x211   : > { %v501_v40 = vpack.c.bf16 %v497_v38, %v497_v38 }
 0x212   : > { %v515_v41 = vsel %vm513_vm11, %v500_v0, 0  ;;  %v521_v42 = vsel %vm513_vm11, %v502_v39, 0 }
 0x213   : > { %746 = vmatprep.subr.msk.bf16.mxu0 %vm513_vm11, %v501_v40  ;;  %775 = vmatpush3.bf16.msra.mxu1 %v521_v42 }
 0x214   : > { %524 = vmatpush1.bf16.msra.mxu0 %v515_v41 }
 0x216   : > { %777 = vmatmul.mubr.msk.bf16.vlgmr.msra.gmra.mrb[4].mxu1 %vm509_vm12, %v499_v43 }
 0x217   : > { %747 = vmatmul.mubr.msk.bf16.vlgmr.msra.gmra.mrb[4].mxu0 %vm509_vm12, %v499_v43 }
 0x2e9   : > { %v598_v45 = vpop.f32.mrb[4].mxu1 }
 0x2ea   : > { %v557_v46 = vpop.f32.mrb[4].mxu0  ;;  %v778_v47 = vpop.f32.mrb[5].mxu1  ;;  %v599_v48 = vadd.f32 %v598_v45, %v507_v44 }
 0x2eb   : > { %v559_v49 = vpop.f32.mrb[5].mxu0  ;;  %v558_v50 = vadd.f32 %v557_v46, %v507_v44  ;;  %v601_v51 = vpop.f32.mrb[6].mxu1 }
 0x2ec   : > { %v561_v52 = vpop.f32.mrb[6].mxu0  ;;  %v560_v53 = vadd.f32 %v559_v49, %v507_v44  ;;  %606 = vst [vmem:[%s290_s14 + $0x10] sm:$0x1f] %v599_v48  ;;  %v779_v54 = vpop.f32.mrb[7].mxu1 }
 0x2ed   : > { %604 = vst [vmem:[%s290_s14] sm:$0x1f] %v558_v50  ;;  %v562_v55 = vpop.f32.mrb[7].mxu0 }
 0x2ee   : > { %605 = vst [vmem:[%s290_s14 + $0x8] sm:$0x1f] %v560_v53 }
 0x2ef   : > { %1080 = shalt.err (!%p1077_p0)
}
 0x2f0   : > { %s1081_s22 = scalar_lea.hbm %s1460_s28, 384  ;;  %s1085_s11 = scalar_lea.hbm %s1509_s5, 768 }
 0x2f1   : > { %p1082_p2 = scmp.ne.s32.totalorder %s1460_s28, %s1081_s22  ;;  %p1086_p4 = scmp.lt.u32.totalorder %s1460_s28, %s1509_s5 }
 0x2f2   : > { %p1087_p11 = scmp.lt.u32.totalorder %s1085_s11, %s1081_s22  ;;  %p1089_p5 = scmp.lt.u32.totalorder %s1081_s22, %s1460_s28 }
 0x2f3   : > { %p1083_p8 = pnand %p1082_p2, %p1526_p6 }
 0x2f4   : > { %p1088_p1 = por %p1087_p11, %p1086_p4 }
 0x2f5   : > { %p1084_p10 = pneg %p1083_p8 }
 0x2f6   : > { %p1090_p7 = por %p1089_p5, %p1088_p1 }
 0x2f8   : > { %p1091_p9 = pnand %p1090_p7, %p1084_p10 }
 0x2fa   : > { %1094 = shalt.err (!%p1091_p9)
}
 0x2fb   : > { %803 = dma.vmem_to_hbm [thread:$0]  (%p1526_p6), %s1462_s16, 384, %s1460_s28, %s608_s24  }
 0x2fc PF: > { %s634_s10 = sand.u32 1, %s1129_s18   ;;  %p1527_p12 = scmp.ne.s32.totalorder %s1519_s9, 0 }
 0x2fd   : > { %p1528_p3 = scmp.ge.s32.totalorder %s1141_s21, 2  ;;  %s635_s14 = scalar_lea.sflag [#allocation4], %s634_s10 }
 0x2ff   : > { %p823_p13 = pnand %p1528_p3, %p1527_p12 }
 0x301   : > { %1124 = dma.done.wait (!%p823_p13), %s635_s14, 384  }
 0x302   : > { %1126 = vsyncadd (!%p823_p13), %s635_s14, 4294966912  ;;  %p20_p0 = scmp.ge.s32.totalorder %s1333_s30, 4   ;;  %s1529_s18 = smov %s1133_s19 }
 0x303   : > { %s1530_s19 = smov %s1137_s20  ;;  %s1531_s20 = smov %s1344_s6 }
 0x304   : > { %s1532_s21 = smov %s1333_s30  ;;  %22 = sbr.rel (!%p20_p0) target bundleno = 7 (0x7), region = 101 }
 0x30b   :  { %640 = vsyncpa [#allocation3], 1 }
 0x30c   :  { %642 = vsyncpa [#allocation3 + $0x1], 1 }
 0x30d   :  { %643 = vsyncpa [#allocation6], 1 }
 0x30e   :  { %644 = vsyncpa [#allocation9], 1 }
 0x30f   :  { %645 = vsyncpa [#allocation4], 1 }
 0x310   :  { %647 = vsyncpa [#allocation4 + $0x1], 1 }

</bundles_post_ra>
